<compile_context>
chip_gen: v7x
topology: tpu7x:2x2x1
jax: 0.10.0
libtpu: 0.0.40
codegen_flags: <defaults>
</compile_context>

<pallas_src>
from functools import partial

import jax
import jax.numpy as jnp
from jax.experimental import pallas as pl
from jax.experimental.pallas import tpu as pltpu

LANE = 128
SUBLANE = 8


def _round_up(n, m):
    return ((n + m - 1) // m) * m


def _cdiv(a, b):
    return (a + b - 1) // b


def _activationnet_kernel(x_ref, w_ref, b_ref, out_ref):
    """Fused 3-layer MLP.  x_ref: (tile_b, in_dim) f32, w_ref: (3, K, K) bf16,
    b_ref: (3, K) f32, out_ref: (tile_b, out_dim) f32."""
    in_dim = x_ref.shape[1]      # 32  (unpadded)
    out_dim = out_ref.shape[1]   # 16  (unpadded)

    # In-kernel cast to bf16 for the MXU (removes the wrapper pre-pass over x).
    x = x_ref[...].astype(jnp.bfloat16)                       # (tile_b, in_dim)

    # layer1: Linear + ReLU.  Contract against the valid in_dim rows of w1.
    h1 = jnp.dot(x, w_ref[0, :in_dim, :],
                 preferred_element_type=jnp.float32)          # (tile_b, K)
    h1 = jnp.maximum(h1 + b_ref[0:1, :], 0.0)

    # layer2: Linear + ReLU.  Zero-padded lanes stay exactly zero.
    h2 = jnp.dot(h1.astype(jnp.bfloat16), w_ref[1],
                 preferred_element_type=jnp.float32)          # (tile_b, K)
    h2 = jnp.maximum(h2 + b_ref[1:2, :], 0.0)

    # layer3: Linear (no activation).  Store only the valid out_dim columns.
    y = jnp.dot(h2.astype(jnp.bfloat16), w_ref[2],
                preferred_element_type=jnp.float32)           # (tile_b, K)
    y = y + b_ref[2:3, :]
    out_ref[...] = y[:, :out_dim].astype(out_ref.dtype)


def prepare_params(params):
    """One-time prep (hoisted out of the per-call path).

    - Zero-pads every weight to a common (K, K) with K = round_up(max dim, 128)
      and stacks them into a single (3, K, K) bf16 operand.
    - Packs the three biases into one (3, K) f32 operand.
    Zero padding survives the bf16 cast exactly, so padded lanes stay zero
    through matmul / bias-add / ReLU.
    """
    in_dim, h1 = params["w1"].shape
    _, h2 = params["w2"].shape
    _, out_dim = params["w3"].shape
    K = _round_up(max(in_dim, h1, h2, out_dim), LANE)

    def pad_sq(w):
        r, c = w.shape
        return jnp.pad(w, ((0, K - r), (0, K - c)))

    w = jnp.stack([pad_sq(params["w1"]),
                   pad_sq(params["w2"]),
                   pad_sq(params["w3"])]).astype(jnp.bfloat16)   # (3, K, K)

    b = jnp.zeros((3, K), jnp.float32)
    b = b.at[0, :h1].set(params["b1"])
    b = b.at[1, :h2].set(params["b2"])
    b = b.at[2, :out_dim].set(params["b3"])

    return {"w": w, "b": b, "out_dim": out_dim}


@partial(jax.jit, static_argnames=("out_dim",))
def activationnet_forward(x, w, b, *, out_dim):
    """Fused forward pass.  x: (B, in_dim) f32.  Returns (B, out_dim) f32."""
    B, in_dim = x.shape
    K = w.shape[-1]

    # Batch tiling:
    #   * small B  -> single sublane-aligned tile (launch-bound, grid=(1,)),
    #   * large B  -> 512..2048-row tiles AND >= 2 grid steps so v7x's two
    #     TensorCores both get work via the "parallel" axis.
    if B <= 256:
        tile_b = _round_up(B, SUBLANE)
    else:
        n_tiles = max(2, _cdiv(B, 2048))
        tile_b = _round_up(_cdiv(B, n_tiles), SUBLANE)
    B_p = _round_up(B, tile_b)

    xp = x if B_p == B else jnp.pad(x, ((0, B_p - B), (0, 0)))

    flops = 2 * B_p * (in_dim * K + K * K + K * K)
    bytes_accessed = (B_p * in_dim * 4      # x (f32, unpadded lanes)
                      + 3 * K * K * 2       # packed weights (bf16)
                      + 3 * K * 4           # packed biases (f32)
                      + B_p * out_dim * 4)  # narrow output (f32)

    out = pl.pallas_call(
        _activationnet_kernel,
        out_shape=jax.ShapeDtypeStruct((B_p, out_dim), jnp.float32),
        grid=(B_p // tile_b,),
        in_specs=[
            # x: lane dim == full array dim (32) -> legal, no lane padding.
            pl.BlockSpec((tile_b, in_dim), lambda i: (i, 0)),
            # Weights/biases: constant block index -> VMEM-resident across
            # batch tiles (no re-DMA per tile).
            pl.BlockSpec((3, K, K), lambda i: (0, 0, 0)),
            pl.BlockSpec((3, K), lambda i: (0, 0)),
        ],
        # Narrow output: lane dim == full array dim (16) -> legal; avoids the
        # 8x-padded f32 writeback that dominated HBM bytes at large batch.
        out_specs=pl.BlockSpec((tile_b, out_dim), lambda i: (i, 0)),
        compiler_params=pltpu.CompilerParams(
            dimension_semantics=("parallel",)),
        cost_estimate=pl.CostEstimate(
            flops=flops, transcendentals=0, bytes_accessed=bytes_accessed),
    )(xp, w, b)

    return out if B_p == B else out[:B]


def init_params(key, in_dim, n_hidden_1, n_hidden_2, out_dim):
    """Deterministic init mimicking nn.Linear's uniform(-1/sqrt(fan_in), +).

    Weights are stored pre-transposed as (in, out) so the kernel does plain
    y = x @ W (PyTorch stores (out, in) and computes x @ W^T)."""
    ks = jax.random.split(key, 6)

    def linear_init(kw, kb, fan_in, fan_out):
        bound = 1.0 / jnp.sqrt(jnp.float32(fan_in))
        w = jax.random.uniform(kw, (fan_in, fan_out), jnp.float32, -bound, bound)
        b = jax.random.uniform(kb, (fan_out,), jnp.float32, -bound, bound)
        return w, b

    w1, b1 = linear_init(ks[0], ks[1], in_dim, n_hidden_1)
    w2, b2 = linear_init(ks[2], ks[3], n_hidden_1, n_hidden_2)
    w3, b3 = linear_init(ks[4], ks[5], n_hidden_2, out_dim)
    return {"w1": w1, "b1": b1, "w2": w2, "b2": b2, "w3": w3, "b3": b3}


def activationnet_ref(x, p):
    """Full-precision (f32) pure-JAX reference matching the PyTorch module."""
    h = jnp.maximum(x @ p["w1"] + p["b1"], 0.0)
    h = jnp.maximum(h @ p["w2"] + p["b2"], 0.0)
    return h @ p["w3"] + p["b3"]


def activationnet_ref_bf16(x, prep):
    """Matched-precision reference (bf16 MXU inputs, f32 accumulation)."""
    w, b, out_dim = prep["w"], prep["b"], prep["out_dim"]
    in_dim = x.shape[1]
    xb = x.astype(jnp.bfloat16)
    h1 = jnp.maximum(
        jnp.dot(xb, w[0, :in_dim, :], preferred_element_type=jnp.float32)
        + b[0:1, :], 0.0)
    h2 = jnp.maximum(
        jnp.dot(h1.astype(jnp.bfloat16), w[1], preferred_element_type=jnp.float32)
        + b[1:2, :], 0.0)
    y = (jnp.dot(h2.astype(jnp.bfloat16), w[2], preferred_element_type=jnp.float32)
         + b[2:3, :])
    return y[:, :out_dim]


if __name__ == "__main__":
    in_dim, n_hidden_1, n_hidden_2, out_dim = 32, 64, 48, 16
    batch = 8

    key = jax.random.PRNGKey(0)
    k_params, k_x = jax.random.split(key)
    params = init_params(k_params, in_dim, n_hidden_1, n_hidden_2, out_dim)
    x = jax.random.normal(k_x, (batch, in_dim), dtype=jnp.float32)

    prep = prepare_params(params)
    out = activationnet_forward(x, prep["w"], prep["b"], out_dim=prep["out_dim"])
    out = jax.block_until_ready(out)

    assert out.shape == (batch, out_dim)

    # Tight check against a reference at the same (bf16-input, f32-accumulate)
    # precision as the kernel.
    ref_bf16 = activationnet_ref_bf16(x, prep)
    assert jnp.allclose(out, ref_bf16, atol=1e-3, rtol=1e-3), \
        "mismatch vs matched-precision reference"

    # Looser check against the full-f32 model (bounds bf16 rounding error).
    ref_f32 = activationnet_ref(x, params)
    assert jnp.allclose(out, ref_f32, atol=5e-2, rtol=5e-2), \
        "mismatch vs f32 reference"

    print("KERNEL_OK")
</pallas_src>

<mosaic_0001>
module attributes {stable_mosaic.version = 11 : i64} {
  func.func @_activationnet_kernel(%arg0: i32, %arg1: memref<8x32xf32, #tpu.memory_space<vmem>>, %arg2: memref<3x128x128xbf16, #tpu.memory_space<vmem>>, %arg3: memref<3x128xf32, #tpu.memory_space<vmem>>, %arg4: memref<8x16xf32, #tpu.memory_space<vmem>>) attributes {dimension_semantics = [#tpu.dimension_semantics<parallel>], iteration_bounds = array<i64: 1>, scalar_prefetch = 0 : i64, scratch_operands = 0 : i64, tpu.core_type = #tpu.core_type<tc>, window_params = [{transform_indices = @transform_0, window_bounds = array<i64: 8, 32>}, {pipeline_mode = #tpu.pipeline_mode<synchronous>, transform_indices = @transform_1, window_bounds = array<i64: 3, 128, 128>}, {pipeline_mode = #tpu.pipeline_mode<synchronous>, transform_indices = @transform_2, window_bounds = array<i64: 3, 128>}, {transform_indices = @transform_3, window_bounds = array<i64: 8, 16>}]} {
    %c0 = arith.constant 0 : index
    %c0_0 = arith.constant 0 : index
    %0 = vector.load %arg1[%c0, %c0_0] : memref<8x32xf32, #tpu.memory_space<vmem>>, vector<8x32xf32>
    %1 = arith.truncf %0 : vector<8x32xf32> to vector<8x32xbf16>
    %c0_1 = arith.constant 0 : index
    %c0_2 = arith.constant 0 : index
    %c0_3 = arith.constant 0 : index
    %2 = vector.load %arg2[%c0_1, %c0_2, %c0_3] : memref<3x128x128xbf16, #tpu.memory_space<vmem>>, vector<1x32x128xbf16>
    %3 = vector.shape_cast %2 : vector<1x32x128xbf16> to vector<32x128xbf16>
    %cst = arith.constant dense<0.000000e+00> : vector<8x128xf32>
    %4 = tpu.matmul %1, %3, %cst {dimension_numbers = #tpu.dot_dimension_numbers<[1], [0], [0], [1], [0, 0, 1, 1], [], []>} : vector<8x32xbf16>, vector<32x128xbf16>, vector<8x128xf32> -> vector<8x128xf32>
    %c0_4 = arith.constant 0 : index
    %c0_5 = arith.constant 0 : index
    %5 = vector.load %arg3[%c0_4, %c0_5] : memref<3x128xf32, #tpu.memory_space<vmem>>, vector<1x128xf32>
    %6 = vector.broadcast %5 : vector<1x128xf32> to vector<8x128xf32>
    %7 = arith.addf %4, %6 : vector<8x128xf32>
    %cst_6 = arith.constant 0.000000e+00 : f32
    %8 = vector.broadcast %cst_6 : f32 to vector<8x128xf32>
    %9 = arith.maximumf %7, %8 : vector<8x128xf32>
    %10 = arith.truncf %9 : vector<8x128xf32> to vector<8x128xbf16>
    %c1 = arith.constant 1 : index
    %c0_7 = arith.constant 0 : index
    %c0_8 = arith.constant 0 : index
    %11 = vector.load %arg2[%c1, %c0_7, %c0_8] : memref<3x128x128xbf16, #tpu.memory_space<vmem>>, vector<1x128x128xbf16>
    %12 = vector.shape_cast %11 : vector<1x128x128xbf16> to vector<128x128xbf16>
    %cst_9 = arith.constant dense<0.000000e+00> : vector<8x128xf32>
    %13 = tpu.matmul %10, %12, %cst_9 {dimension_numbers = #tpu.dot_dimension_numbers<[1], [0], [0], [1], [0, 0, 1, 1], [], []>} : vector<8x128xbf16>, vector<128x128xbf16>, vector<8x128xf32> -> vector<8x128xf32>
    %c1_10 = arith.constant 1 : index
    %c0_11 = arith.constant 0 : index
    %14 = vector.load %arg3[%c1_10, %c0_11] : memref<3x128xf32, #tpu.memory_space<vmem>>, vector<1x128xf32>
    %15 = vector.broadcast %14 : vector<1x128xf32> to vector<8x128xf32>
    %16 = arith.addf %13, %15 : vector<8x128xf32>
    %cst_12 = arith.constant 0.000000e+00 : f32
    %17 = vector.broadcast %cst_12 : f32 to vector<8x128xf32>
    %18 = arith.maximumf %16, %17 : vector<8x128xf32>
    %19 = arith.truncf %18 : vector<8x128xf32> to vector<8x128xbf16>
    %c2 = arith.constant 2 : index
    %c0_13 = arith.constant 0 : index
    %c0_14 = arith.constant 0 : index
    %20 = vector.load %arg2[%c2, %c0_13, %c0_14] : memref<3x128x128xbf16, #tpu.memory_space<vmem>>, vector<1x128x128xbf16>
    %21 = vector.shape_cast %20 : vector<1x128x128xbf16> to vector<128x128xbf16>
    %cst_15 = arith.constant dense<0.000000e+00> : vector<8x128xf32>
    %22 = tpu.matmul %19, %21, %cst_15 {dimension_numbers = #tpu.dot_dimension_numbers<[1], [0], [0], [1], [0, 0, 1, 1], [], []>} : vector<8x128xbf16>, vector<128x128xbf16>, vector<8x128xf32> -> vector<8x128xf32>
    %c2_16 = arith.constant 2 : index
    %c0_17 = arith.constant 0 : index
    %23 = vector.load %arg3[%c2_16, %c0_17] : memref<3x128xf32, #tpu.memory_space<vmem>>, vector<1x128xf32>
    %24 = vector.broadcast %23 : vector<1x128xf32> to vector<8x128xf32>
    %25 = arith.addf %22, %24 : vector<8x128xf32>
    %26 = vector.extract_strided_slice %25 {offsets = [0, 0], sizes = [8, 16], strides = [1, 1]} : vector<8x128xf32> to vector<8x16xf32>
    %c0_18 = arith.constant 0 : index
    %c0_19 = arith.constant 0 : index
    %27 = vector.load %arg4[%c0_18, %c0_19] : memref<8x16xf32, #tpu.memory_space<vmem>>, vector<8x16xf32>
    tpu.vector_store %arg4[%c0_18, %c0_19], %26 {strides = array<i32>} : memref<8x16xf32, #tpu.memory_space<vmem>>, vector<8x16xf32>,
    return
  }
  func.func @transform_0(%arg0: i32) -> (i32, i32) {
    %c0_i32 = arith.constant 0 : i32
    %c0_i32_0 = arith.constant 0 : i32
    return %arg0, %c0_i32 : i32, i32
  }
  func.func @transform_1(%arg0: i32) -> (i32, i32, i32) {
    %c0_i32 = arith.constant 0 : i32
    %c0_i32_0 = arith.constant 0 : i32
    %c0_i32_1 = arith.constant 0 : i32
    %c0_i32_2 = arith.constant 0 : i32
    return %c0_i32, %c0_i32_0, %c0_i32_1 : i32, i32, i32
  }
  func.func @transform_2(%arg0: i32) -> (i32, i32) {
    %c0_i32 = arith.constant 0 : i32
    %c0_i32_0 = arith.constant 0 : i32
    %c0_i32_1 = arith.constant 0 : i32
    return %c0_i32, %c0_i32_0 : i32, i32
  }
  func.func @transform_3(%arg0: i32) -> (i32, i32) {
    %c0_i32 = arith.constant 0 : i32
    %c0_i32_0 = arith.constant 0 : i32
    return %arg0, %c0_i32 : i32, i32
  }
}

</mosaic_0001>

<bundles_post_ra>
// kernel: activationnet_forward.1
= control target key start
LH: loop header
LB: loop body
LE: loop exit
PB: predicated region body
PF: predicated region fallthrough
CT: control target
= control target key end

     0   :  { %8 = vsyncpa [#allocation3], 0  ;;  %s642_s0 = inlined_call_operand.hbm [shape: f32[8,32], index: 0, kind: input, shape index: {}]   ;;  %s643_s1 = inlined_call_operand.hbm [shape: bf16[3,128,128], index: 1, kind: input, shape index: {}]   ;;  %s644_s2 = inlined_call_operand.vmem [shape: f32[3,128], index: 2, kind: input, shape index: {}]   ;;  %s645_s3 = inlined_call_operand.hbm [shape: f32[8,16], index: 3, kind: output, shape index: {}]  }
   0x1   :  { %9 = vsyncpa [#allocation6], 0 }
   0x2   :  { %10 = vsyncpa [#allocation4], 0  ;;  %s539_s12 = smov [#allocation2]   ;;  %s540_s14 = smov [#allocation5]  }
   0x3   :  { %s17_s13 = sshll.u32 %s539_s12, 4  ;;  %s26_s15 = sshll.u32 %s540_s14, 4  ;;  %s18_s13 = int_to_ptr.vmem [resolvable:$true] %s17_s13  ;;  %s566_s15 = int_to_ptr.vmem [resolvable:$true] %s26_s15 }
   0x4   :  { %s467_s18 = scalar_lea.hbm %s642_s0, 128 }
   0x5   :  { %p468_p0 = scmp.ne.s32.totalorder %s642_s0, %s467_s18  ;;  %p471_p1 = scmp.lt.u32.totalorder %s467_s18, %s642_s0 }
   0x7   :  { %p473_p2 = pnand %p471_p1, %p468_p0 }
   0x9   :  { %476 = shalt.err (!%p473_p2)
}
   0xa   :  { %s477_s23 = scalar_lea.vmem %s18_s13, 128  ;;  %p482_p4 = scmp.lt.s32.totalorder %s18_s13, %s18_s13 }
   0xb   :  { %p478_p3 = scmp.ne.s32.totalorder %s18_s13, %s477_s23  ;;  %p483_p5 = scmp.lt.s32.totalorder %s477_s23, %s477_s23 }
   0xd   :  { %p484_p6 = por %p483_p5, %p482_p4 }
   0xf   :  { %p485_p7 = pnand %p484_p6, %p478_p3 }
  0x11   :  { %488 = shalt.err (!%p485_p7)
}
  0x12   :  { %20 = dma.hbm_to_vmem [thread:$0]  %s642_s0, 128, %s18_s13, [#allocation3]  }
  0x13   :  { %s489_s28 = scalar_lea.hbm %s643_s1, 3072 }
  0x14   :  { %p490_p8 = scmp.ne.s32.totalorder %s643_s1, %s489_s28  ;;  %p493_p9 = scmp.lt.u32.totalorder %s489_s28, %s643_s1 }
  0x16   :  { %p495_p10 = pnand %p493_p9, %p490_p8 }
  0x18   :  { %498 = shalt.err (!%p495_p10)
}
  0x19   :  { %s499_s6 = scalar_lea.vmem %s566_s15, 3072  ;;  %p504_p12 = scmp.lt.s32.totalorder %s566_s15, %s566_s15 }
  0x1a   :  { %p500_p11 = scmp.ne.s32.totalorder %s566_s15, %s499_s6  ;;  %p505_p13 = scmp.lt.s32.totalorder %s499_s6, %s499_s6 }
  0x1c   :  { %p506_p0 = por %p505_p13, %p504_p12 }
  0x1e   :  { %p507_p1 = pnand %p506_p0, %p500_p11 }
  0x20   :  { %510 = shalt.err (!%p507_p1)
}
  0x21   :  { %s541_s0 = smov 64   ;;  %s542_s7 = smov 4  }
  0x22   :  { %32 = dma.hbm_to_vmem [thread:$0]  %s643_s1, 3072, %s566_s15, [#allocation6], %s541_s0, %s541_s0, %s542_s7  }
  0x23   :  { %533 = dma.done.wait [#allocation3], 128  }
  0x24   :  { %534 = vsyncadd [#allocation3], 4294967168 }
  0x25   :  { %535 = dma.done.wait [#allocation6], 3072  }
  0x26   :  { %536 = vsyncadd [#allocation6], 4294964224  ;;  %v543_v0 = vmov 0.0   ;;  %vm544_vm0 = vmmov 0   ;;  %v449_v1 = vld [vmem:[#allocation5] sm:$0xff]   ;;  %v450_v2 = vld [vmem:[#allocation5 + $0x8] sm:$0xff]  }
  0x27   :  { %394 = vmatprep.subr.bf16.mxu0 %v543_v0  ;;  %398 = vmatprep.mubr.msk.bf16.mxu0 %vm544_vm0, %v543_v0  ;;  %v42_v3 = vld [vmem:[#allocation2] sm:$0xff]  ;;  %v451_v4 = vld [vmem:[#allocation5 + $0x40] sm:$0xff]   ;;  %v452_v6 = vld [vmem:[#allocation5 + $0x48] sm:$0xff]   ;;  %vm65_vm1 = vcmask 261120   ;;  %s545_s15 = smov [#allocation7]   ;;  %vm333_vm2 = vcmask 130048  }
  0x28   :  { %402 = vmatprep.subr.bf16.mxu1 %v543_v0  ;;  %418 = vmatprep.mubr.msk.bf16.mxu1 %vm544_vm0, %v543_v0  ;;  %v43_v5 = vpack.c.bf16 %v42_v3, %v42_v3  ;;  %v453_v7 = vld [vmem:[#allocation5 + $0x50] sm:$0xff]   ;;  %v454_v8 = vld [vmem:[#allocation5 + $0x58] sm:$0xff]   ;;  %v455_v9 = vld [vmem:[#allocation5 + $0x60] sm:$0xff]   ;;  %s341_s16 = sshll.u32 %s545_s15, 4  ;;  %s342_s16 = int_to_ptr.vmem [resolvable:$true] %s341_s16 }
  0x29   :  { %395 = vmatpush3.bf16.msra.mxu0 %v449_v1  ;;  %403 = vmatpush3.bf16.msra.mxu1 %v451_v4  ;;  %v456_v10 = vld [vmem:[#allocation5 + $0x68] sm:$0xff]   ;;  %v457_v11 = vld [vmem:[#allocation5 + $0x70] sm:$0xff]   ;;  %v458_v12 = vld [vmem:[#allocation5 + $0x78] sm:$0xff]   ;;  %s511_s17 = scalar_lea.vmem %s342_s16, 128  ;;  %p516_p3 = scmp.lt.s32.totalorder %s342_s16, %s342_s16 }
  0x2a   :  { %396 = vmatprep.subr.bf16.mxu0 %v543_v0  ;;  %404 = vmatprep.subr.bf16.mxu1 %v543_v0  ;;  %v459_v13 = vld [vmem:[#allocation5 + $0x80] sm:$0xff]   ;;  %v460_v14 = vld [vmem:[#allocation5 + $0x88] sm:$0xff]   ;;  %v461_v15 = vld [vmem:[#allocation5 + $0x90] sm:$0xff]   ;;  %p512_p2 = scmp.ne.s32.totalorder %s342_s16, %s511_s17  ;;  %p517_p4 = scmp.lt.s32.totalorder %s511_s17, %s511_s17 }
  0x2b   :  { %v462_v16 = vld [vmem:[#allocation5 + $0x98] sm:$0xff]   ;;  %v463_v17 = vld [vmem:[#allocation5 + $0xa0] sm:$0xff]   ;;  %v464_v18 = vld [vmem:[#allocation5 + $0xa8] sm:$0xff]  }
  0x2c   :  { %v351_v19 = vld [vmem:[%s644_s2] ss:$0 sm:$0xff]  ;;  %v465_v27 = vld [vmem:[#allocation5 + $0xb0] sm:$0xff]   ;;  %v355_v29 = vld [vmem:[%s644_s2 + $0x1] ss:$0 sm:$0xff]  ;;  %p518_p5 = por %p517_p4, %p516_p3 }
  0x2d   :  { %397 = vmatpush3.bf16.msra.mxu0 %v450_v2  ;;  %405 = vmatpush3.bf16.msra.mxu1 %v452_v6  ;;  %v466_v28 = vld [vmem:[#allocation5 + $0xb8] sm:$0xff]  }
  0x2e   :  { %422 = vmatprep.subr.bf16.mxu0 %v543_v0  ;;  %406 = vmatprep.subr.bf16.mxu1 %v543_v0  ;;  %v364_v37 = vld [vmem:[%s644_s2 + $0x2] ss:$0 sm:$0xff]  ;;  %p519_p6 = pnand %p518_p5, %p512_p2 }
  0x30   :  { %399 = vmatmul.mubr.msk.bf16.vlgmr.msra.gmra.mrb[0].mxu0 %vm65_vm1, %v43_v5 }
  0x31   :  { %438 = vmatprep.mubr.msk.bf16.mxu0 %vm544_vm0, %v543_v0  ;;  %407 = vmatpush3.bf16.msra.mxu1 %v453_v7 }
  0x32   :  { %408 = vmatprep.subr.bf16.mxu1 %v543_v0  ;;  %423 = vmatpush3.bf16.msra.mxu0 %v459_v13 }
  0x33   :  { %424 = vmatprep.subr.bf16.mxu0 %v543_v0 }
  0x35   :  { %409 = vmatpush3.bf16.msra.mxu1 %v454_v8 }
  0x36   :  { %410 = vmatprep.subr.bf16.mxu1 %v543_v0  ;;  %425 = vmatpush3.bf16.msra.mxu0 %v460_v14 }
  0x37   :  { %426 = vmatprep.subr.bf16.mxu0 %v543_v0 }
  0x39   :  { %411 = vmatpush3.bf16.msra.mxu1 %v455_v9 }
  0x3a   :  { %412 = vmatprep.subr.bf16.mxu1 %v543_v0  ;;  %427 = vmatpush3.bf16.msra.mxu0 %v461_v15 }
  0x3b   :  { %428 = vmatprep.subr.bf16.mxu0 %v543_v0 }
  0x3d   :  { %413 = vmatpush3.bf16.msra.mxu1 %v456_v10 }
  0x3e   :  { %414 = vmatprep.subr.bf16.mxu1 %v543_v0  ;;  %429 = vmatpush3.bf16.msra.mxu0 %v462_v16 }
  0x3f   :  { %430 = vmatprep.subr.bf16.mxu0 %v543_v0 }
  0x41   :  { %415 = vmatpush3.bf16.msra.mxu1 %v457_v11 }
  0x42   :  { %416 = vmatprep.subr.bf16.mxu1 %v543_v0  ;;  %431 = vmatpush3.bf16.msra.mxu0 %v463_v17 }
  0x43   :  { %432 = vmatprep.subr.bf16.mxu0 %v543_v0 }
  0x45   :  { %417 = vmatpush3.bf16.msra.mxu1 %v458_v12 }
  0x46   :  { %433 = vmatpush3.bf16.msra.mxu0 %v464_v18 }
  0x47   :  { %434 = vmatprep.subr.bf16.mxu0 %v543_v0 }
  0x4a   :  { %435 = vmatpush3.bf16.msra.mxu0 %v465_v27 }
  0x4b   :  { %436 = vmatprep.subr.bf16.mxu0 %v543_v0 }
  0x4e   :  { %437 = vmatpush3.bf16.msra.mxu0 %v466_v28 }
 0x103   :  { %v103_v20 = vpop.f32.mrb[0].mxu0 }
 0x104   :  { %v104_v21 = vadd.f32 %v351_v19, %v103_v20  ;;  %v400_v22 = vpop.f32.mrb[1].mxu0 }
 0x105   :  { %v106_v23 = vpop.f32.mrb[2].mxu0 }
 0x106   :  { %v109_v24 = vmax.f32 %v104_v21, 0.0  ;;  %v401_v25 = vpop.f32.mrb[3].mxu0 }
 0x108   :  { %v110_v26 = vpack.c.bf16 %v109_v24, %v109_v24 }
 0x10a   :  { %419 = vmatmul.mubr.bf16.vlgmr.msra.gmra.mrb[0].mxu1 %v110_v26 }
 0x1dd   :  { %v215_v30 = vpop.f32.mrb[0].mxu1 }
 0x1de   :  { %v216_v31 = vadd.f32 %v355_v29, %v215_v30  ;;  %v420_v32 = vpop.f32.mrb[1].mxu1 }
 0x1df   :  { %v218_v33 = vpop.f32.mrb[2].mxu1 }
 0x1e0   :  { %v221_v34 = vmax.f32 %v216_v31, 0.0  ;;  %v421_v35 = vpop.f32.mrb[3].mxu1 }
 0x1e2   :  { %v222_v36 = vpack.c.bf16 %v221_v34, %v221_v34 }
 0x1e4   :  { %439 = vmatmul.mubr.bf16.vlgmr.msra.gmra.mrb[4].mxu0 %v222_v36 }
 0x2b7   :  { %v327_v38 = vpop.f32.mrb[4].mxu0 }
 0x2b8   :  { %v328_v39 = vadd.f32 %v364_v37, %v327_v38  ;;  %v440_v40 = vpop.f32.mrb[5].mxu0 }
 0x2b9   :  { %v330_v41 = vpop.f32.mrb[6].mxu0 }
 0x2ba   :  { %v441_v42 = vpop.f32.mrb[7].mxu0  ;;  %334 = vst.msk [vmem:[#allocation7] sm:$0xff] %vm333_vm2, %v328_v39 }
 0x2bb   :  { %522 = shalt.err (!%p519_p6)
}
 0x2bc   :  { %s523_s2 = scalar_lea.hbm %s645_s3, 128 }
 0x2bd   :  { %p524_p7 = scmp.ne.s32.totalorder %s645_s3, %s523_s2  ;;  %p527_p8 = scmp.lt.u32.totalorder %s523_s2, %s645_s3 }
 0x2bf   :  { %p529_p9 = pnand %p527_p8, %p524_p7 }
 0x2c1   :  { %532 = shalt.err (!%p529_p9)
}
 0x2c2   :  { %344 = dma.vmem_to_hbm [thread:$0]  %s342_s16, 128, %s645_s3, [#allocation4]  }
 0x2c3   :  { %537 = dma.done.wait [#allocation4], 128  }
 0x2c4   :  { %538 = vsyncadd [#allocation4], 4294967168 }
 0x2c5   :  { %348 = vsyncpa [#allocation3], 1 }
 0x2c6   :  { %349 = vsyncpa [#allocation6], 1 }
 0x2c7   :  { %350 = vsyncpa [#allocation4], 1 }

</bundles_post_ra>
